<compile_context>
chip_gen: v7x
topology: tpu7x:2x2x1
jax: 0.10.0
libtpu: 0.0.40
codegen_flags: <defaults>
</compile_context>

<pallas_src>
import jax
import jax.numpy as jnp
from jax.experimental import pallas as pl
from jax.experimental.pallas import tpu as pltpu

LATENT = 64
HIDDEN = 256
IMAGE = 784


def _round_up(x, m):
    return ((x + m - 1) // m) * m


def _generator_kernel(x_ref, w1_ref, b1_ref, w2_ref, b2_ref, w3_ref, b3_ref,
                      o_ref):
    # x and weights are bf16; MXU matmuls accumulate in f32.
    h1 = jnp.dot(x_ref[...], w1_ref[...], preferred_element_type=jnp.float32)
    h1 = jnp.maximum(h1 + b1_ref[...], 0.0)

    h2 = jnp.dot(h1.astype(jnp.bfloat16), w2_ref[...],
                 preferred_element_type=jnp.float32)
    h2 = jnp.maximum(h2 + b2_ref[...], 0.0)

    h3 = jnp.dot(h2.astype(jnp.bfloat16), w3_ref[...],
                 preferred_element_type=jnp.float32)
    # Bias add + tanh in f32 (safe on v5e); cast to bf16 at the store so the
    # (TB, 784) output tile is half the HBM bytes.  (On v6e/v7x a bf16 tanh
    # would double EUP rate, but DMA is the binding slot here.)
    o_ref[...] = jnp.tanh(h3 + b3_ref[...]).astype(o_ref.dtype)


def prepare_params(params):
    """Cast weights to bf16 for the kernel; biases stay f32 (f32 VPU add)."""
    w1, b1, w2, b2, w3, b3 = params
    return (w1.astype(jnp.bfloat16), b1,
            w2.astype(jnp.bfloat16), b2,
            w3.astype(jnp.bfloat16), b3)


def _choose_batch_tile(batch, tb_max):
    """Pick the batch tile: large for DMA amortisation, >=2 tiles for v7x."""
    bp = _round_up(batch, 8)          # sublane granularity
    if bp < 256:
        return bp                     # single tile, no extra padded rows
    # >= 256 rows: use at least 2 tiles (multiples of 128) so v7x's two
    # TensorCores both get work, as large as tb_max to amortise per-step
    # overhead, but shrink if an awkward batch would pad > ~25% extra rows.
    tb = min(tb_max, _round_up((bp + 1) // 2, 128))
    while tb > 128 and (_round_up(bp, tb) - bp) * 4 > bp:
        tb = max(128, _round_up(tb // 2, 128))
    return tb


def generator_forward(x, kernel_params, *, tb=1024):
    """x: (B, 64) float -> (B, 784) bfloat16 (tanh-bounded outputs)."""
    w1, b1, w2, b2, w3, b3 = kernel_params
    batch = x.shape[0]

    tb_eff = _choose_batch_tile(batch, tb)
    batch_pad = _round_up(batch, tb_eff)

    # Feed the kernel bf16 input (halves input DMA); pad batch rows only if
    # needed (padded rows are discarded below).
    xp = x.astype(jnp.bfloat16)
    if batch_pad != batch:
        xp = jnp.pad(xp, ((0, batch_pad - batch), (0, 0)))

    grid = (pl.cdiv(batch_pad, tb_eff),)
    const = lambda i: (0, 0)   # weights/biases: same VMEM block every step

    out = pl.pallas_call(
        _generator_kernel,
        out_shape=jax.ShapeDtypeStruct((batch_pad, IMAGE), jnp.bfloat16),
        grid=grid,
        in_specs=[
            pl.BlockSpec((tb_eff, LATENT), lambda i: (i, 0)),
            pl.BlockSpec((LATENT, HIDDEN), const),
            pl.BlockSpec((1, HIDDEN), const),
            pl.BlockSpec((HIDDEN, HIDDEN), const),
            pl.BlockSpec((1, HIDDEN), const),
            pl.BlockSpec((HIDDEN, IMAGE), const),
            pl.BlockSpec((1, IMAGE), const),
        ],
        out_specs=pl.BlockSpec((tb_eff, IMAGE), lambda i: (i, 0)),
        compiler_params=pltpu.CompilerParams(
            dimension_semantics=("parallel",),
            vmem_limit_bytes=32 * 1024 * 1024),
    )(xp, w1, b1, w2, b2, w3, b3)

    if batch_pad != batch:
        out = out[:batch]
    return out


def init_params(key):
    """PyTorch-style uniform(-1/sqrt(fan_in), 1/sqrt(fan_in)) init.

    Weights are stored pre-transposed as (in_features, out_features) so
    y = x @ W + b matches PyTorch's y = x @ W_pt.T + b.
    """
    ks = jax.random.split(key, 6)

    def uniform(k, shape, fan_in):
        bound = 1.0 / jnp.sqrt(jnp.float32(fan_in))
        return jax.random.uniform(k, shape, jnp.float32, -bound, bound)

    w1 = uniform(ks[0], (LATENT, HIDDEN), LATENT)
    b1 = uniform(ks[1], (1, HIDDEN), LATENT)
    w2 = uniform(ks[2], (HIDDEN, HIDDEN), HIDDEN)
    b2 = uniform(ks[3], (1, HIDDEN), HIDDEN)
    w3 = uniform(ks[4], (HIDDEN, IMAGE), HIDDEN)
    b3 = uniform(ks[5], (1, IMAGE), HIDDEN)
    return (w1, b1, w2, b2, w3, b3)


def generator_reference(x, params):
    w1, b1, w2, b2, w3, b3 = params
    h1 = jnp.maximum(x @ w1 + b1, 0.0)
    h2 = jnp.maximum(h1 @ w2 + b2, 0.0)
    return jnp.tanh(h2 @ w3 + b3)


if __name__ == "__main__":
    key = jax.random.PRNGKey(0)
    pkey, xkey = jax.random.split(key)
    params = init_params(pkey)
    kernel_params = prepare_params(params)

    batch = 8
    x = jax.random.normal(xkey, (batch, LATENT), jnp.float32)

    out = generator_forward(x, kernel_params)
    out = jax.block_until_ready(out)

    ref = generator_reference(x, params)   # full-f32 reference
    assert out.shape == (batch, IMAGE), out.shape
    assert out.dtype == jnp.bfloat16, out.dtype
    # bf16 weights/activations in the matmuls + bf16 output store -> loosened
    # tolerance vs the f32 reference (tanh-bounded, so absolute tol is apt).
    assert jnp.allclose(out.astype(jnp.float32), ref, atol=2.5e-2, rtol=0.0), \
        "mismatch vs reference"

    print("KERNEL_OK")
</pallas_src>

<mosaic_0001>
module attributes {stable_mosaic.version = 11 : i64} {
  func.func @_generator_kernel(%arg0: i32, %arg1: memref<8x64xbf16, #tpu.memory_space<vmem>>, %arg2: memref<64x256xbf16, #tpu.memory_space<vmem>>, %arg3: memref<1x256xf32, #tpu.memory_space<vmem>>, %arg4: memref<256x256xbf16, #tpu.memory_space<vmem>>, %arg5: memref<1x256xf32, #tpu.memory_space<vmem>>, %arg6: memref<256x784xbf16, #tpu.memory_space<vmem>>, %arg7: memref<1x784xf32, #tpu.memory_space<vmem>>, %arg8: memref<8x784xbf16, #tpu.memory_space<vmem>>) attributes {dimension_semantics = [#tpu.dimension_semantics<parallel>], iteration_bounds = array<i64: 1>, scalar_prefetch = 0 : i64, scratch_operands = 0 : i64, tpu.core_type = #tpu.core_type<tc>, window_params = [{transform_indices = @transform_0, window_bounds = array<i64: 8, 64>}, {pipeline_mode = #tpu.pipeline_mode<synchronous>, transform_indices = @transform_1, window_bounds = array<i64: 64, 256>}, {pipeline_mode = #tpu.pipeline_mode<synchronous>, transform_indices = @transform_2, window_bounds = array<i64: 1, 256>}, {pipeline_mode = #tpu.pipeline_mode<synchronous>, transform_indices = @transform_3, window_bounds = array<i64: 256, 256>}, {pipeline_mode = #tpu.pipeline_mode<synchronous>, transform_indices = @transform_4, window_bounds = array<i64: 1, 256>}, {pipeline_mode = #tpu.pipeline_mode<synchronous>, transform_indices = @transform_5, window_bounds = array<i64: 256, 784>}, {pipeline_mode = #tpu.pipeline_mode<synchronous>, transform_indices = @transform_6, window_bounds = array<i64: 1, 784>}, {transform_indices = @transform_7, window_bounds = array<i64: 8, 784>}]} {
    %c0 = arith.constant 0 : index
    %c0_0 = arith.constant 0 : index
    %0 = vector.load %arg1[%c0, %c0_0] : memref<8x64xbf16, #tpu.memory_space<vmem>>, vector<8x64xbf16>
    %c0_1 = arith.constant 0 : index
    %c0_2 = arith.constant 0 : index
    %1 = vector.load %arg2[%c0_1, %c0_2] : memref<64x256xbf16, #tpu.memory_space<vmem>>, vector<64x256xbf16>
    %cst = arith.constant dense<0.000000e+00> : vector<8x256xf32>
    %2 = tpu.matmul %0, %1, %cst {dimension_numbers = #tpu.dot_dimension_numbers<[1], [0], [0], [1], [0, 0, 1, 1], [], []>} : vector<8x64xbf16>, vector<64x256xbf16>, vector<8x256xf32> -> vector<8x256xf32>
    %c0_3 = arith.constant 0 : index
    %c0_4 = arith.constant 0 : index
    %3 = vector.load %arg3[%c0_3, %c0_4] : memref<1x256xf32, #tpu.memory_space<vmem>>, vector<1x256xf32>
    %4 = vector.broadcast %3 : vector<1x256xf32> to vector<8x256xf32>
    %5 = arith.addf %2, %4 : vector<8x256xf32>
    %cst_5 = arith.constant 0.000000e+00 : f32
    %6 = vector.broadcast %cst_5 : f32 to vector<8x256xf32>
    %7 = arith.maximumf %5, %6 : vector<8x256xf32>
    %8 = arith.truncf %7 : vector<8x256xf32> to vector<8x256xbf16>
    %c0_6 = arith.constant 0 : index
    %c0_7 = arith.constant 0 : index
    %9 = vector.load %arg4[%c0_6, %c0_7] : memref<256x256xbf16, #tpu.memory_space<vmem>>, vector<256x256xbf16>
    %cst_8 = arith.constant dense<0.000000e+00> : vector<8x256xf32>
    %10 = tpu.matmul %8, %9, %cst_8 {dimension_numbers = #tpu.dot_dimension_numbers<[1], [0], [0], [1], [0, 0, 1, 1], [], []>} : vector<8x256xbf16>, vector<256x256xbf16>, vector<8x256xf32> -> vector<8x256xf32>
    %c0_9 = arith.constant 0 : index
    %c0_10 = arith.constant 0 : index
    %11 = vector.load %arg5[%c0_9, %c0_10] : memref<1x256xf32, #tpu.memory_space<vmem>>, vector<1x256xf32>
    %12 = vector.broadcast %11 : vector<1x256xf32> to vector<8x256xf32>
    %13 = arith.addf %10, %12 : vector<8x256xf32>
    %cst_11 = arith.constant 0.000000e+00 : f32
    %14 = vector.broadcast %cst_11 : f32 to vector<8x256xf32>
    %15 = arith.maximumf %13, %14 : vector<8x256xf32>
    %16 = arith.truncf %15 : vector<8x256xf32> to vector<8x256xbf16>
    %c0_12 = arith.constant 0 : index
    %c0_13 = arith.constant 0 : index
    %17 = vector.load %arg6[%c0_12, %c0_13] : memref<256x784xbf16, #tpu.memory_space<vmem>>, vector<256x784xbf16>
    %cst_14 = arith.constant dense<0.000000e+00> : vector<8x784xf32>
    %18 = tpu.matmul %16, %17, %cst_14 {dimension_numbers = #tpu.dot_dimension_numbers<[1], [0], [0], [1], [0, 0, 1, 1], [], []>} : vector<8x256xbf16>, vector<256x784xbf16>, vector<8x784xf32> -> vector<8x784xf32>
    %c0_15 = arith.constant 0 : index
    %c0_16 = arith.constant 0 : index
    %19 = vector.load %arg7[%c0_15, %c0_16] : memref<1x784xf32, #tpu.memory_space<vmem>>, vector<1x784xf32>
    %20 = vector.broadcast %19 : vector<1x784xf32> to vector<8x784xf32>
    %21 = arith.addf %18, %20 : vector<8x784xf32>
    %22 = math.tanh %21 : vector<8x784xf32>
    %23 = arith.truncf %22 : vector<8x784xf32> to vector<8x784xbf16>
    %c0_17 = arith.constant 0 : index
    %c0_18 = arith.constant 0 : index
    %24 = vector.load %arg8[%c0_17, %c0_18] : memref<8x784xbf16, #tpu.memory_space<vmem>>, vector<8x784xbf16>
    tpu.vector_store %arg8[%c0_17, %c0_18], %23 {strides = array<i32>} : memref<8x784xbf16, #tpu.memory_space<vmem>>, vector<8x784xbf16>,
    return
  }
  func.func @transform_0(%arg0: i32) -> (i32, i32) {
    %c0_i32 = arith.constant 0 : i32
    %c0_i32_0 = arith.constant 0 : i32
    return %arg0, %c0_i32 : i32, i32
  }
  func.func @transform_1(%arg0: i32) -> (i32, i32) {
    %c0_i32 = arith.constant 0 : i32
    %c0_i32_0 = arith.constant 0 : i32
    %c0_i32_1 = arith.constant 0 : i32
    return %c0_i32, %c0_i32_0 : i32, i32
  }
  func.func @transform_2(%arg0: i32) -> (i32, i32) {
    %c0_i32 = arith.constant 0 : i32
    %c0_i32_0 = arith.constant 0 : i32
    %c0_i32_1 = arith.constant 0 : i32
    return %c0_i32, %c0_i32_0 : i32, i32
  }
  func.func @transform_3(%arg0: i32) -> (i32, i32) {
    %c0_i32 = arith.constant 0 : i32
    %c0_i32_0 = arith.constant 0 : i32
    %c0_i32_1 = arith.constant 0 : i32
    return %c0_i32, %c0_i32_0 : i32, i32
  }
  func.func @transform_4(%arg0: i32) -> (i32, i32) {
    %c0_i32 = arith.constant 0 : i32
    %c0_i32_0 = arith.constant 0 : i32
    %c0_i32_1 = arith.constant 0 : i32
    return %c0_i32, %c0_i32_0 : i32, i32
  }
  func.func @transform_5(%arg0: i32) -> (i32, i32) {
    %c0_i32 = arith.constant 0 : i32
    %c0_i32_0 = arith.constant 0 : i32
    %c0_i32_1 = arith.constant 0 : i32
    return %c0_i32, %c0_i32_0 : i32, i32
  }
  func.func @transform_6(%arg0: i32) -> (i32, i32) {
    %c0_i32 = arith.constant 0 : i32
    %c0_i32_0 = arith.constant 0 : i32
    %c0_i32_1 = arith.constant 0 : i32
    return %c0_i32, %c0_i32_0 : i32, i32
  }
  func.func @transform_7(%arg0: i32) -> (i32, i32) {
    %c0_i32 = arith.constant 0 : i32
    %c0_i32_0 = arith.constant 0 : i32
    return %arg0, %c0_i32 : i32, i32
  }
}

</mosaic_0001>

<bundles_post_ra>
// kernel: tpu_custom_call.1
= control target key start
LH: loop header
LB: loop body
LE: loop exit
PB: predicated region body
PF: predicated region fallthrough
CT: control target
= control target key end

     0   :  { %v1789_v2 = vmov 0   ;;  %vm89_vm0 = vcmask 523264   ;;  %s2336_s0 = inlined_call_operand.vmem [shape: bf16[8,64], index: 0, kind: input, shape index: {}]   ;;  %s2337_s1 = inlined_call_operand.vmem [shape: bf16[64,256], index: 1, kind: input, shape index: {}]   ;;  %s2338_s2 = inlined_call_operand.vmem [shape: f32[1,256], index: 2, kind: input, shape index: {}]   ;;  %s2339_s3 = inlined_call_operand.vmem [shape: bf16[256,256], index: 3, kind: input, shape index: {}]   ;;  %s2340_s4 = inlined_call_operand.vmem [shape: f32[1,256], index: 4, kind: input, shape index: {}]   ;;  %s2341_s5 = inlined_call_operand.vmem [shape: bf16[256,784], index: 5, kind: input, shape index: {}]   ;;  %s2342_s6 = inlined_call_operand.vmem [shape: f32[1,784], index: 6, kind: input, shape index: {}]   ;;  %s2343_s7 = inlined_call_operand.hbm [shape: bf16[8,784], index: 7, kind: output, shape index: {}]  }
   0x1   :  { %v1531_v0 = vld [vmem:[%s2337_s1 + $0x4] ss:$8 sps:$4 sm:$0xff]   ;;  %v1533_v1 = vld [vmem:[%s2337_s1] ss:$8 sps:$4 sm:$0xff]   ;;  %125 = vmatprep.mubr.bf16.mxu0 %v1789_v2  ;;  %v1534_v3 = vld [vmem:[%s2337_s1 + $0x14] ss:$8 sps:$4 sm:$0xff]  }
   0x2   :  { %93 = vmatprep.subr.bf16.mxu0 %v1531_v0  ;;  %v1536_v4 = vld [vmem:[%s2337_s1 + $0x10] ss:$8 sps:$4 sm:$0xff]   ;;  %v1537_v5 = vld [vmem:[%s2337_s1 + $0x24] ss:$8 sps:$4 sm:$0xff]   ;;  %v1539_v6 = vld [vmem:[%s2337_s1 + $0x20] ss:$8 sps:$4 sm:$0xff]  }
   0x3   :  { %94 = vmatpush1.bf16.msra.mxu0 %v1533_v1  ;;  %v1543_v7 = vld [vmem:[%s2339_s3 + $0x4] ss:$8 sps:$4 sm:$0xff]   ;;  %v1545_v8 = vld [vmem:[%s2339_s3] ss:$8 sps:$4 sm:$0xff]   ;;  %v1546_v9 = vld [vmem:[%s2339_s3 + $0x14] ss:$8 sps:$4 sm:$0xff]  }
   0x4   :  { %95 = vmatprep.subr.bf16.mxu0 %v1534_v3  ;;  %v1540_v10 = vld [vmem:[%s2337_s1 + $0x34] ss:$8 sps:$4 sm:$0xff]   ;;  %342 = vmatprep.subr.bf16.mxu1 %v1543_v7  ;;  %v1548_v11 = vld [vmem:[%s2339_s3 + $0x10] ss:$8 sps:$4 sm:$0xff]   ;;  %v1549_v12 = vld [vmem:[%s2339_s3 + $0x24] ss:$8 sps:$4 sm:$0xff]  }
   0x5   :  { %343 = vmatpush1.bf16.msra.mxu1 %v1545_v8  ;;  %v1542_v13 = vld [vmem:[%s2337_s1 + $0x30] ss:$8 sps:$4 sm:$0xff]   ;;  %v1551_v14 = vld [vmem:[%s2339_s3 + $0x20] ss:$8 sps:$4 sm:$0xff]   ;;  %v1552_v15 = vld [vmem:[%s2339_s3 + $0x34] ss:$8 sps:$4 sm:$0xff]  }
   0x6   :  { %344 = vmatprep.subr.bf16.mxu1 %v1546_v9  ;;  %v28_v16 = vld [vmem:[%s2336_s0] sm:$0xf]  ;;  %v1554_v17 = vld [vmem:[%s2339_s3 + $0x30] ss:$8 sps:$4 sm:$0xff]   ;;  %v1555_v18 = vld [vmem:[%s2339_s3 + $0x44] ss:$8 sps:$4 sm:$0xff]  }
   0x7   :  { %96 = vmatpush1.bf16.msra.mxu0 %v1536_v4  ;;  %v1557_v19 = vld [vmem:[%s2339_s3 + $0x40] ss:$8 sps:$4 sm:$0xff]   ;;  %v1558_v20 = vld [vmem:[%s2339_s3 + $0x54] ss:$8 sps:$4 sm:$0xff]   ;;  %v1560_v21 = vld [vmem:[%s2339_s3 + $0x50] ss:$8 sps:$4 sm:$0xff]  }
   0x8   :  { %97 = vmatprep.subr.bf16.mxu0 %v1537_v5  ;;  %v1561_v22 = vld [vmem:[%s2339_s3 + $0x64] ss:$8 sps:$4 sm:$0xff]   ;;  %v1563_v23 = vld [vmem:[%s2339_s3 + $0x60] ss:$8 sps:$4 sm:$0xff]   ;;  %v1564_v24 = vld [vmem:[%s2339_s3 + $0x74] ss:$8 sps:$4 sm:$0xff]  }
   0x9   :  { %345 = vmatpush1.bf16.msra.mxu1 %v1548_v11  ;;  %v1566_v25 = vld [vmem:[%s2339_s3 + $0x70] ss:$8 sps:$4 sm:$0xff]   ;;  %v1567_v26 = vld [vmem:[%s2339_s3 + $0x84] ss:$8 sps:$4 sm:$0xff]   ;;  %v1569_v27 = vld [vmem:[%s2339_s3 + $0x80] ss:$8 sps:$4 sm:$0xff]  }
   0xa   :  { %346 = vmatprep.subr.bf16.mxu1 %v1549_v12  ;;  %v1570_v28 = vld [vmem:[%s2339_s3 + $0x94] ss:$8 sps:$4 sm:$0xff]   ;;  %v1572_v29 = vld [vmem:[%s2339_s3 + $0x90] ss:$8 sps:$4 sm:$0xff]   ;;  %v1573_v30 = vld [vmem:[%s2339_s3 + $0xa4] ss:$8 sps:$4 sm:$0xff]  }
   0xb   :  { %98 = vmatpush1.bf16.msra.mxu0 %v1539_v6  ;;  %v1575_v31 = vld [vmem:[%s2339_s3 + $0xa0] ss:$8 sps:$4 sm:$0xff]   ;;  %v1576_v32 = vld [vmem:[%s2339_s3 + $0xb4] ss:$8 sps:$4 sm:$0xff]   ;;  %v1578_v33 = vld [vmem:[%s2339_s3 + $0xb0] ss:$8 sps:$4 sm:$0xff]  }
   0xc   :  { %99 = vmatprep.subr.bf16.mxu0 %v1540_v10  ;;  %v1579_v34 = vld [vmem:[%s2339_s3 + $0xc4] ss:$8 sps:$4 sm:$0xff]   ;;  %v1581_v35 = vld [vmem:[%s2339_s3 + $0xc0] ss:$8 sps:$4 sm:$0xff]   ;;  %v1582_v36 = vld [vmem:[%s2339_s3 + $0xd4] ss:$8 sps:$4 sm:$0xff]  }
   0xd   :  { %347 = vmatpush1.bf16.msra.mxu1 %v1551_v14  ;;  %v1584_v37 = vld [vmem:[%s2339_s3 + $0xd0] ss:$8 sps:$4 sm:$0xff]  }
   0xe   :  { %348 = vmatprep.subr.bf16.mxu1 %v1552_v15 }
   0xf   :  { %100 = vmatpush1.bf16.msra.mxu0 %v1542_v13 }
  0x11   :  { %349 = vmatpush1.bf16.msra.mxu1 %v1554_v17 }
  0x12   :  { %1354 = vmatmul.mubr.msk.bf16.vlgmr.msra.gmra.mrb[0].mxu0 %vm89_vm0, %v28_v16  ;;  %350 = vmatprep.subr.bf16.mxu1 %v1555_v18 }
  0x15   :  { %351 = vmatpush1.bf16.msra.mxu1 %v1557_v19 }
  0x16   :  { %352 = vmatprep.subr.bf16.mxu1 %v1558_v20 }
  0x19   :  { %353 = vmatpush1.bf16.msra.mxu1 %v1560_v21 }
  0x1a   :  { %354 = vmatprep.subr.bf16.mxu1 %v1561_v22 }
  0x1d   :  { %355 = vmatpush1.bf16.msra.mxu1 %v1563_v23 }
  0x1e   :  { %356 = vmatprep.subr.bf16.mxu1 %v1564_v24 }
  0x21   :  { %357 = vmatpush1.bf16.msra.mxu1 %v1566_v25 }
  0x22   :  { %358 = vmatprep.subr.bf16.mxu1 %v1567_v26 }
  0x25   :  { %359 = vmatpush1.bf16.msra.mxu1 %v1569_v27 }
  0x26   :  { %360 = vmatprep.subr.bf16.mxu1 %v1570_v28 }
  0x29   :  { %361 = vmatpush1.bf16.msra.mxu1 %v1572_v29 }
  0x2a   :  { %362 = vmatprep.subr.bf16.mxu1 %v1573_v30 }
  0x2d   :  { %363 = vmatpush1.bf16.msra.mxu1 %v1575_v31 }
  0x2e   :  { %364 = vmatprep.subr.bf16.mxu1 %v1576_v32 }
  0x31   :  { %365 = vmatpush1.bf16.msra.mxu1 %v1578_v33 }
  0x32   :  { %366 = vmatprep.subr.bf16.mxu1 %v1579_v34 }
  0x35   :  { %367 = vmatpush1.bf16.msra.mxu1 %v1581_v35 }
  0x36   :  { %368 = vmatprep.subr.bf16.mxu1 %v1582_v36 }
  0x39   :  { %369 = vmatpush1.bf16.msra.mxu1 %v1584_v37 }
  0x3a   :  { %12 = vsyncpa [#allocation3], 0  ;;  %v1585_v38 = vld [vmem:[%s2339_s3 + $0xe4] ss:$8 sps:$4 sm:$0xff]   ;;  %v1587_v39 = vld [vmem:[%s2339_s3 + $0xe0] ss:$8 sps:$4 sm:$0xff]   ;;  %v39_v7 = vlaneseq }
  0x3b   :  { %370 = vmatprep.subr.bf16.mxu1 %v1585_v38  ;;  %v1588_v40 = vld [vmem:[%s2339_s3 + $0xf4] ss:$8 sps:$4 sm:$0xff]   ;;  %v1590_v41 = vld [vmem:[%s2339_s3 + $0xf0] ss:$8 sps:$4 sm:$0xff]   ;;  %v1593_v43 = vld [vmem:[%s2341_s5 + $0x4] ss:$28 sps:$4 sm:$0xff]  }
  0x3c   :  { %v1591_v42 = vld [vmem:[%s2341_s5] ss:$28 sps:$4 sm:$0xff]   ;;  %v1596_v44 = vld [vmem:[%s2341_s5 + $0xc] ss:$28 sps:$4 sm:$0xff]   ;;  %1128 = vmatprep.subr.bf16.mxu0 %v1593_v43  ;;  %v1597_v46 = vld [vmem:[%s2341_s5 + $0x38] ss:$28 sps:$4 sm:$0xff]  }
  0x3d   :  { %371 = vmatpush1.bf16.msra.mxu1 %v1587_v39  ;;  %v1599_v45 = vld [vmem:[%s2341_s5 + $0x3c] ss:$28 sps:$4 sm:$0xff]   ;;  %1129 = vmatpush1.bf16.msra.mxu0 %v1591_v42  ;;  %v1605_v47 = vld [vmem:[%s2341_s5 + $0x74] ss:$28 sps:$4 sm:$0xff]   ;;  %v1611_v49 = vld [vmem:[%s2341_s5 + $0xac] ss:$28 sps:$4 sm:$0xff]  }
  0x3e   :  { %372 = vmatprep.subr.bf16.mxu1 %v1588_v40  ;;  %1130 = vmatprep.subr.bf16.mxu0 %v1599_v45  ;;  %v1603_v48 = vld [vmem:[%s2341_s5 + $0x70] ss:$28 sps:$4 sm:$0xff]   ;;  %v1609_v50 = vld [vmem:[%s2341_s5 + $0xa8] ss:$28 sps:$4 sm:$0xff]   ;;  %v1615_v52 = vld [vmem:[%s2341_s5 + $0xe0] ss:$28 sps:$4 sm:$0xff]  }
  0x3f   :  { %v1617_v51 = vld [vmem:[%s2341_s5 + $0xe4] ss:$28 sps:$4 sm:$0xff]   ;;  %v1623_v53 = vld [vmem:[%s2341_s5 + $0x11c] ss:$28 sps:$4 sm:$0xff]   ;;  %v1629_v55 = vld [vmem:[%s2341_s5 + $0x154] ss:$28 sps:$4 sm:$0xff]  }
  0x40   :  { %v1621_v54 = vld [vmem:[%s2341_s5 + $0x118] ss:$28 sps:$4 sm:$0xff]   ;;  %v1627_v56 = vld [vmem:[%s2341_s5 + $0x150] ss:$28 sps:$4 sm:$0xff]   ;;  %v1633_v58 = vld [vmem:[%s2341_s5 + $0x188] ss:$28 sps:$4 sm:$0xff]  }
  0x41   :  { %373 = vmatpush1.bf16.msra.mxu1 %v1590_v41  ;;  %1131 = vmatpush1.bf16.msra.mxu0 %v1597_v46  ;;  %v1635_v57 = vld [vmem:[%s2341_s5 + $0x18c] ss:$28 sps:$4 sm:$0xff]   ;;  %v1641_v59 = vld [vmem:[%s2341_s5 + $0x1c4] ss:$28 sps:$4 sm:$0xff]   ;;  %v1647_v61 = vld [vmem:[%s2341_s5 + $0x1fc] ss:$28 sps:$4 sm:$0xff]  }
  0x42   :  { %1169 = vmatprep.subr.bf16.mxu1 %v1596_v44  ;;  %1132 = vmatprep.subr.bf16.mxu0 %v1605_v47  ;;  %v1639_v60 = vld [vmem:[%s2341_s5 + $0x1c0] ss:$28 sps:$4 sm:$0xff]   ;;  %v1645_v62 = vld [vmem:[%s2341_s5 + $0x1f8] ss:$28 sps:$4 sm:$0xff]   ;;  %v1651_v0 = vld [vmem:[%s2341_s5 + $0x230] ss:$28 sps:$4 sm:$0xff]  }
  0x43   :  { %v1653_v63 = vld [vmem:[%s2341_s5 + $0x234] ss:$28 sps:$4 sm:$0xff]   ;;  %v1659_v1 = vld [vmem:[%s2341_s5 + $0x26c] ss:$28 sps:$4 sm:$0xff]   ;;  %v1665_v3 = vld [vmem:[%s2341_s5 + $0x2a4] ss:$28 sps:$4 sm:$0xff]  }
  0x44   :  { %v1657_v2 = vld [vmem:[%s2341_s5 + $0x268] ss:$28 sps:$4 sm:$0xff]   ;;  %v1663_v4 = vld [vmem:[%s2341_s5 + $0x2a0] ss:$28 sps:$4 sm:$0xff]   ;;  %v1669_v6 = vld [vmem:[%s2341_s5 + $0x2d8] ss:$28 sps:$4 sm:$0xff]  }
  0x45   :  { %1133 = vmatpush1.bf16.msra.mxu0 %v1603_v48  ;;  %v1671_v5 = vld [vmem:[%s2341_s5 + $0x2dc] ss:$28 sps:$4 sm:$0xff]   ;;  %v2041_v8 = vshrl.u32 %v39_v7, 7  ;;  %v37_v10 = vld [vmem:[%s2338_s2] sm:$0x3]  ;;  %vm1330_vm1 = vcmask 125952  }
  0x46   :  { %1134 = vmatprep.subr.bf16.mxu0 %v1611_v49  ;;  %v1594_v23 = vld [vmem:[%s2341_s5 + $0x8] ss:$28 sps:$4 sm:$0xff]   ;;  %v1600_v26 = vld [vmem:[%s2341_s5 + $0x40] ss:$28 sps:$4 sm:$0xff]   ;;  %v1606_v28 = vld [vmem:[%s2341_s5 + $0x78] ss:$28 sps:$4 sm:$0xff]  }
  0x47   :  { %v2044_v9 = vsub.s32 0, %v2041_v8  ;;  %v2050_v11 = vsub.s32 1, %v2041_v8  ;;  %v1602_v25 = vld [vmem:[%s2341_s5 + $0x44] ss:$28 sps:$4 sm:$0xff]   ;;  %v1608_v27 = vld [vmem:[%s2341_s5 + $0x7c] ss:$28 sps:$4 sm:$0xff]  }
  0x48   :  { %v1614_v29 = vld [vmem:[%s2341_s5 + $0xb4] ss:$28 sps:$4 sm:$0xff]   ;;  %v1620_v31 = vld [vmem:[%s2341_s5 + $0xec] ss:$28 sps:$4 sm:$0xff]   ;;  %v1626_v33 = vld [vmem:[%s2341_s5 + $0x124] ss:$28 sps:$4 sm:$0xff]  }
  0x49   :  { %1135 = vmatpush1.bf16.msra.mxu0 %v1609_v50  ;;  %v42_v12 = vrot.slane %v37_v10, %v2044_v9  ;;  %v46_v13 = vrot.slane %v37_v10, %v2050_v11  ;;  %v1612_v30 = vld [vmem:[%s2341_s5 + $0xb0] ss:$28 sps:$4 sm:$0xff]   ;;  %v1618_v32 = vld [vmem:[%s2341_s5 + $0xe8] ss:$28 sps:$4 sm:$0xff]   ;;  %v1624_v34 = vld [vmem:[%s2341_s5 + $0x120] ss:$28 sps:$4 sm:$0xff]  }
  0x4a   :  { %1136 = vmatprep.subr.bf16.mxu0 %v1617_v51  ;;  %v1632_v35 = vld [vmem:[%s2341_s5 + $0x15c] ss:$28 sps:$4 sm:$0xff]   ;;  %v1638_v37 = vld [vmem:[%s2341_s5 + $0x194] ss:$28 sps:$4 sm:$0xff]   ;;  %v1644_v39 = vld [vmem:[%s2341_s5 + $0x1cc] ss:$28 sps:$4 sm:$0xff]  }
  0x4b   :  { %v1630_v36 = vld [vmem:[%s2341_s5 + $0x158] ss:$28 sps:$4 sm:$0xff]   ;;  %v1636_v38 = vld [vmem:[%s2341_s5 + $0x190] ss:$28 sps:$4 sm:$0xff]   ;;  %v1642_v40 = vld [vmem:[%s2341_s5 + $0x1c8] ss:$28 sps:$4 sm:$0xff]  }
  0x4c   :  { %v1650_v41 = vld [vmem:[%s2341_s5 + $0x204] ss:$28 sps:$4 sm:$0xff]   ;;  %v1656_v43 = vld [vmem:[%s2341_s5 + $0x23c] ss:$28 sps:$4 sm:$0xff]   ;;  %v1662_v45 = vld [vmem:[%s2341_s5 + $0x274] ss:$28 sps:$4 sm:$0xff]  }
  0x4d   :  { %1137 = vmatpush1.bf16.msra.mxu0 %v1615_v52  ;;  %v1648_v42 = vld [vmem:[%s2341_s5 + $0x200] ss:$28 sps:$4 sm:$0xff]   ;;  %v1654_v44 = vld [vmem:[%s2341_s5 + $0x238] ss:$28 sps:$4 sm:$0xff]   ;;  %v1660_v46 = vld [vmem:[%s2341_s5 + $0x270] ss:$28 sps:$4 sm:$0xff]  }
  0x4e   :  { %1138 = vmatprep.subr.bf16.mxu0 %v1623_v53  ;;  %v1668_v47 = vld [vmem:[%s2341_s5 + $0x2ac] ss:$28 sps:$4 sm:$0xff]   ;;  %v1674_v49 = vld [vmem:[%s2341_s5 + $0x2e4] ss:$28 sps:$4 sm:$0xff]   ;;  %v1677_v51 = vld [vmem:[%s2341_s5 + $0x314] ss:$28 sps:$4 sm:$0xff]  }
  0x4f   :  { %v1666_v48 = vld [vmem:[%s2341_s5 + $0x2a8] ss:$28 sps:$4 sm:$0xff]   ;;  %v1672_v50 = vld [vmem:[%s2341_s5 + $0x2e0] ss:$28 sps:$4 sm:$0xff]   ;;  %v1675_v53 = vld [vmem:[%s2341_s5 + $0x310] ss:$28 sps:$4 sm:$0xff]  }
  0x50   :  { %v1680_v52 = vld [vmem:[%s2341_s5 + $0x31c] ss:$28 sps:$4 sm:$0xff]  }
  0x51   :  { %1139 = vmatpush1.bf16.msra.mxu0 %v1621_v54  ;;  %v1678_v54 = vld [vmem:[%s2341_s5 + $0x318] ss:$28 sps:$4 sm:$0xff]  }
  0x52   :  { %1140 = vmatprep.subr.bf16.mxu0 %v1629_v55  ;;  %v1683_v55 = vld [vmem:[%s2341_s5 + $0x34c] ss:$28 sps:$4 sm:$0xff]  }
  0x55   :  { %1141 = vmatpush1.bf16.msra.mxu0 %v1627_v56  ;;  %v1686_v56 = vld [vmem:[%s2341_s5 + $0x354] ss:$28 sps:$4 sm:$0xff]  }
  0x56   :  { %1142 = vmatprep.subr.bf16.mxu0 %v1635_v57  ;;  %v1681_v57 = vld [vmem:[%s2341_s5 + $0x348] ss:$28 sps:$4 sm:$0xff]  }
  0x59   :  { %1143 = vmatpush1.bf16.msra.mxu0 %v1633_v58  ;;  %v1684_v58 = vld [vmem:[%s2341_s5 + $0x350] ss:$28 sps:$4 sm:$0xff]  }
  0x5a   :  { %1144 = vmatprep.subr.bf16.mxu0 %v1641_v59  ;;  %v1689_v59 = vld [vmem:[%s2341_s5 + $0x14] ss:$28 sps:$4 sm:$0xff]  }
  0x5d   :  { %1145 = vmatpush1.bf16.msra.mxu0 %v1639_v60  ;;  %v1690_v60 = vld [vmem:[%s2341_s5 + $0x1d8] ss:$28 sps:$4 sm:$0xff]  }
  0x5e   :  { %1146 = vmatprep.subr.bf16.mxu0 %v1647_v61  ;;  %v170_v61 = vld [vmem:[%s2340_s4] sm:$0x3] }
  0x61   :  { %1147 = vmatpush1.bf16.msra.mxu0 %v1645_v62  ;;  %v175_v62 = vrot.slane %v170_v61, %v2044_v9 }
  0x62   :  { %1148 = vmatprep.subr.bf16.mxu0 %v1653_v63  ;;  %v179_v63 = vrot.slane %v170_v61, %v2050_v11  ;;  %v531_v61 = vsub.s32 3, %v2041_v8 }
  0x65   :  { %1149 = vmatpush1.bf16.msra.mxu0 %v1651_v0 }
  0x66   :  { %1150 = vmatprep.subr.bf16.mxu0 %v1659_v1 }
  0x69   :  { %1151 = vmatpush1.bf16.msra.mxu0 %v1657_v2 }
  0x6a   :  { %1152 = vmatprep.subr.bf16.mxu0 %v1665_v3 }
  0x6d   :  { %1153 = vmatpush1.bf16.msra.mxu0 %v1663_v4 }
  0x6e   :  { %1154 = vmatprep.subr.bf16.mxu0 %v1671_v5 }
  0x71   :  { %1155 = vmatpush1.bf16.msra.mxu0 %v1669_v6 }
  0x72   :  { %1156 = vmatprep.subr.bf16.mxu0 %v1677_v51  ;;  %v1741_v51 = vld [vmem:[%s2341_s5 + $0x2b4] ss:$28 sps:$4 sm:$0xff]  }
  0x75   :  { %1157 = vmatpush1.bf16.msra.mxu0 %v1675_v53  ;;  %v1744_v53 = vld [vmem:[%s2341_s5 + $0x2ec] ss:$28 sps:$4 sm:$0xff]  }
  0x76   :  { %1158 = vmatprep.subr.bf16.mxu0 %v1683_v55  ;;  %v1747_v55 = vld [vmem:[%s2341_s5 + $0x324] ss:$28 sps:$4 sm:$0xff]  }
  0x79   :  { %1159 = vmatpush1.bf16.msra.mxu0 %v1681_v57  ;;  %v1750_v57 = vld [vmem:[%s2341_s5 + $0x35c] ss:$28 sps:$4 sm:$0xff]  }
  0x7a   :  { %1210 = vmatprep.subr.bf16.mxu0 %v1689_v59  ;;  %v527_v59 = vsub.s32 2, %v2041_v8 }
  0xe5   :  { %v127_v14 = vpop.f32.mrb[0].mxu0 }
  0xe6   :  { %v128_v15 = vadd.f32 %v127_v14, %v42_v12  ;;  %v129_v16 = vpop.f32.mrb[1].mxu0  ;;  %v1687_v12 = vld [vmem:[%s2341_s5 + $0x10] ss:$28 sps:$4 sm:$0xff]  }
  0xe7   :  { %v130_v17 = vadd.f32 %v129_v16, %v46_v13  ;;  %v131_v18 = vpop.f32.mrb[2].mxu0  ;;  %v1691_v13 = vld [vmem:[%s2341_s5 + $0x18] ss:$28 sps:$4 sm:$0xff]   ;;  %v1695_v16 = vld [vmem:[%s2341_s5 + $0x210] ss:$28 sps:$4 sm:$0xff]  }
  0xe8   :  { %v134_v19 = vmax.f32 %v128_v15, 0.0  ;;  %v132_v20 = vpop.f32.mrb[3].mxu0  ;;  %v1694_v15 = vld [vmem:[%s2341_s5 + $0x4c] ss:$28 sps:$4 sm:$0xff]  }
  0xe9   :  { %v135_v21 = vmax.f32 %v130_v17, 0.0  ;;  %v1692_v17 = vld [vmem:[%s2341_s5 + $0x48] ss:$28 sps:$4 sm:$0xff]   ;;  %v1696_v18 = vld [vmem:[%s2341_s5 + $0x50] ss:$28 sps:$4 sm:$0xff]  }
  0xea   :  { %v136_v24 = vpack.c.bf16 %v134_v19, %v134_v19  ;;  %v1699_v19 = vld [vmem:[%s2341_s5 + $0x84] ss:$28 sps:$4 sm:$0xff]  }
  0xeb   :  { %v137_v22 = vpack.c.bf16 %v135_v21, %v135_v21  ;;  %v1700_v20 = vld [vmem:[%s2341_s5 + $0x248] ss:$28 sps:$4 sm:$0xff]   ;;  %v1697_v21 = vld [vmem:[%s2341_s5 + $0x80] ss:$28 sps:$4 sm:$0xff]  }
  0xed   :  { %374 = vmatprep.mubr.bf16.mxu1 %v137_v22  ;;  %v1701_v22 = vld [vmem:[%s2341_s5 + $0x88] ss:$28 sps:$4 sm:$0xff]  }
  0xee   :  { %375 = vmatmul.mubr.bf16.vlgmr.msra.gmra.mrb[0].mxu1 %v136_v24  ;;  %v1705_v24 = vld [vmem:[%s2341_s5 + $0x280] ss:$28 sps:$4 sm:$0xff]  }
  0xef   :  { %1170 = vmatpush1.bf16.msra.mxu1 %v1594_v23  ;;  %v1704_v23 = vld [vmem:[%s2341_s5 + $0xbc] ss:$28 sps:$4 sm:$0xff]  }
  0xf0   :  { %1171 = vmatprep.subr.bf16.mxu1 %v1602_v25  ;;  %v1702_v25 = vld [vmem:[%s2341_s5 + $0xb8] ss:$28 sps:$4 sm:$0xff]  }
  0xf3   :  { %1172 = vmatpush1.bf16.msra.mxu1 %v1600_v26  ;;  %v1706_v26 = vld [vmem:[%s2341_s5 + $0xc0] ss:$28 sps:$4 sm:$0xff]  }
  0xf4   :  { %1173 = vmatprep.subr.bf16.mxu1 %v1608_v27  ;;  %v1709_v27 = vld [vmem:[%s2341_s5 + $0xf4] ss:$28 sps:$4 sm:$0xff]  }
  0xf7   :  { %1174 = vmatpush1.bf16.msra.mxu1 %v1606_v28  ;;  %v1710_v28 = vld [vmem:[%s2341_s5 + $0x2b8] ss:$28 sps:$4 sm:$0xff]  }
  0xf8   :  { %1175 = vmatprep.subr.bf16.mxu1 %v1614_v29  ;;  %v1707_v29 = vld [vmem:[%s2341_s5 + $0xf0] ss:$28 sps:$4 sm:$0xff]  }
  0xfb   :  { %1176 = vmatpush1.bf16.msra.mxu1 %v1612_v30  ;;  %v1711_v30 = vld [vmem:[%s2341_s5 + $0xf8] ss:$28 sps:$4 sm:$0xff]  }
  0xfc   :  { %1177 = vmatprep.subr.bf16.mxu1 %v1620_v31  ;;  %v1714_v31 = vld [vmem:[%s2341_s5 + $0x12c] ss:$28 sps:$4 sm:$0xff]  }
  0xff   :  { %1178 = vmatpush1.bf16.msra.mxu1 %v1618_v32  ;;  %v1715_v32 = vld [vmem:[%s2341_s5 + $0x2f0] ss:$28 sps:$4 sm:$0xff]  }
 0x100   :  { %1179 = vmatprep.subr.bf16.mxu1 %v1626_v33  ;;  %v1712_v33 = vld [vmem:[%s2341_s5 + $0x128] ss:$28 sps:$4 sm:$0xff]  }
 0x103   :  { %1180 = vmatpush1.bf16.msra.mxu1 %v1624_v34  ;;  %v1716_v34 = vld [vmem:[%s2341_s5 + $0x130] ss:$28 sps:$4 sm:$0xff]  }
 0x104   :  { %1181 = vmatprep.subr.bf16.mxu1 %v1632_v35  ;;  %v1719_v35 = vld [vmem:[%s2341_s5 + $0x164] ss:$28 sps:$4 sm:$0xff]  }
 0x107   :  { %1182 = vmatpush1.bf16.msra.mxu1 %v1630_v36  ;;  %v1720_v36 = vld [vmem:[%s2341_s5 + $0x328] ss:$28 sps:$4 sm:$0xff]  }
 0x108   :  { %1183 = vmatprep.subr.bf16.mxu1 %v1638_v37  ;;  %v1717_v37 = vld [vmem:[%s2341_s5 + $0x160] ss:$28 sps:$4 sm:$0xff]  }
 0x10b   :  { %1184 = vmatpush1.bf16.msra.mxu1 %v1636_v38  ;;  %v1721_v38 = vld [vmem:[%s2341_s5 + $0x168] ss:$28 sps:$4 sm:$0xff]  }
 0x10c   :  { %1185 = vmatprep.subr.bf16.mxu1 %v1644_v39  ;;  %v1724_v39 = vld [vmem:[%s2341_s5 + $0x19c] ss:$28 sps:$4 sm:$0xff]  }
 0x10f   :  { %1186 = vmatpush1.bf16.msra.mxu1 %v1642_v40  ;;  %v1725_v40 = vld [vmem:[%s2341_s5 + $0x360] ss:$28 sps:$4 sm:$0xff]  }
 0x110   :  { %1187 = vmatprep.subr.bf16.mxu1 %v1650_v41  ;;  %v1722_v41 = vld [vmem:[%s2341_s5 + $0x198] ss:$28 sps:$4 sm:$0xff]  }
 0x113   :  { %1188 = vmatpush1.bf16.msra.mxu1 %v1648_v42  ;;  %v1726_v42 = vld [vmem:[%s2341_s5 + $0x1a0] ss:$28 sps:$4 sm:$0xff]  }
 0x114   :  { %1189 = vmatprep.subr.bf16.mxu1 %v1656_v43  ;;  %v1729_v43 = vld [vmem:[%s2341_s5 + $0x1d4] ss:$28 sps:$4 sm:$0xff]  }
 0x117   :  { %1190 = vmatpush1.bf16.msra.mxu1 %v1654_v44  ;;  %v1727_v44 = vld [vmem:[%s2341_s5 + $0x1d0] ss:$28 sps:$4 sm:$0xff]  }
 0x118   :  { %1191 = vmatprep.subr.bf16.mxu1 %v1662_v45  ;;  %v1732_v45 = vld [vmem:[%s2341_s5 + $0x20c] ss:$28 sps:$4 sm:$0xff]  }
 0x11b   :  { %1192 = vmatpush1.bf16.msra.mxu1 %v1660_v46  ;;  %v1730_v46 = vld [vmem:[%s2341_s5 + $0x208] ss:$28 sps:$4 sm:$0xff]  }
 0x11c   :  { %1193 = vmatprep.subr.bf16.mxu1 %v1668_v47  ;;  %v1735_v47 = vld [vmem:[%s2341_s5 + $0x244] ss:$28 sps:$4 sm:$0xff]  }
 0x11f   :  { %1194 = vmatpush1.bf16.msra.mxu1 %v1666_v48  ;;  %v1733_v48 = vld [vmem:[%s2341_s5 + $0x240] ss:$28 sps:$4 sm:$0xff]  }
 0x120   :  { %1195 = vmatprep.subr.bf16.mxu1 %v1674_v49  ;;  %v1738_v49 = vld [vmem:[%s2341_s5 + $0x27c] ss:$28 sps:$4 sm:$0xff]  }
 0x123   :  { %1196 = vmatpush1.bf16.msra.mxu1 %v1672_v50  ;;  %v1736_v50 = vld [vmem:[%s2341_s5 + $0x278] ss:$28 sps:$4 sm:$0xff]  }
 0x124   :  { %1197 = vmatprep.subr.bf16.mxu1 %v1680_v52  ;;  %v1739_v52 = vld [vmem:[%s2341_s5 + $0x2b0] ss:$28 sps:$4 sm:$0xff]  }
 0x127   :  { %1198 = vmatpush1.bf16.msra.mxu1 %v1678_v54  ;;  %v1742_v54 = vld [vmem:[%s2341_s5 + $0x2e8] ss:$28 sps:$4 sm:$0xff]  }
 0x128   :  { %1199 = vmatprep.subr.bf16.mxu1 %v1686_v56  ;;  %v1745_v56 = vld [vmem:[%s2341_s5 + $0x320] ss:$28 sps:$4 sm:$0xff]  }
 0x12b   :  { %1200 = vmatpush1.bf16.msra.mxu1 %v1684_v58  ;;  %v1748_v58 = vld [vmem:[%s2341_s5 + $0x358] ss:$28 sps:$4 sm:$0xff]   ;;  %s1790_s5 = smov [#allocation2]  }
 0x12c   :  { %1507 = vmatprep.subr.bf16.mxu1 %v1690_v60  ;;  %v515_v60 = vld [vmem:[%s2342_s6] sm:$0x7f]  ;;  %s1338_s6 = sshll.u32 %s1790_s5, 4  ;;  %s1339_s6 = int_to_ptr.vmem [resolvable:$true] %s1338_s6 }
 0x12d   :  { %s1765_s18 = scalar_lea.vmem %s1339_s6, 448  ;;  %p1770_p1 = scmp.lt.s32.totalorder %s1339_s6, %s1339_s6 }
 0x12e   :  { %p1766_p0 = scmp.ne.s32.totalorder %s1339_s6, %s1765_s18  ;;  %p1771_p2 = scmp.lt.s32.totalorder %s1765_s18, %s1765_s18 }
 0x130   :  { %p1772_p3 = por %p1771_p2, %p1770_p1 }
 0x132   :  { %p1773_p4 = pnand %p1772_p3, %p1766_p0 }
 0x1c1   :  { %v376_v0 = vpop.f32.mrb[0].mxu1 }
 0x1c2   :  { %v377_v1 = vadd.f32 %v376_v0, %v175_v62  ;;  %v378_v2 = vpop.f32.mrb[1].mxu1  ;;  %v520_v62 = vrot.slane %v515_v60, %v2044_v9  ;;  %v524_v0 = vrot.slane %v515_v60, %v2050_v11 }
 0x1c3   :  { %v379_v3 = vadd.f32 %v378_v2, %v179_v63  ;;  %v380_v4 = vpop.f32.mrb[2].mxu1  ;;  %v528_v63 = vrot.slane %v515_v60, %v527_v59 }
 0x1c4   :  { %v383_v5 = vmax.f32 %v377_v1, 0.0  ;;  %v381_v6 = vpop.f32.mrb[3].mxu1  ;;  %v532_v1 = vrot.slane %v515_v60, %v531_v61 }
 0x1c5   :  { %v384_v7 = vmax.f32 %v379_v3, 0.0 }
 0x1c6   :  { %v2176_v14 = vpack.c.bf16 %v383_v5, %v383_v5 }
 0x1c7   :  { %v386_v10 = vpack.c.bf16 %v384_v7, %v384_v7 }
 0x1c9   :  { %1160 = vmatprep.mubr.bf16.mxu0 %v386_v10  ;;  %1201 = vmatprep.mubr.bf16.mxu1 %v386_v10 }
 0x1ca   :  { %1161 = vmatmul.mubr.bf16.vlgmr.msra.gmra.mrb[4].mxu0 %v2176_v14  ;;  %1202 = vmatmul.mubr.bf16.vlgmr.msra.gmra.mrb[4].mxu1 %v2176_v14 }
 0x1cb   :  { %1211 = vmatpush1.bf16.msra.mxu0 %v1687_v12  ;;  %1508 = vmatpush3.bf16.msra.mxu1 %v1691_v13 }
 0x1cc   :  { %1242 = vmatprep.mubr.bf16.mxu0 %v386_v10  ;;  %1283 = vmatprep.mubr.bf16.mxu1 %v386_v10 }
 0x1cd   :  { %1212 = vmatprep.subr.bf16.mxu0 %v1694_v15  ;;  %1509 = vmatprep.subr.bf16.mxu1 %v1695_v16 }
 0x1cf   :  { %1213 = vmatpush1.bf16.msra.mxu0 %v1692_v17  ;;  %1510 = vmatpush3.bf16.msra.mxu1 %v1696_v18 }
 0x1d0   :  { %1214 = vmatprep.subr.bf16.mxu0 %v1699_v19  ;;  %1511 = vmatprep.subr.bf16.mxu1 %v1700_v20 }
 0x1d3   :  { %1215 = vmatpush1.bf16.msra.mxu0 %v1697_v21  ;;  %1512 = vmatpush3.bf16.msra.mxu1 %v1701_v22  ;;  %v543_v21 = vsub.s32 6, %v2041_v8 }
 0x1d4   :  { %1216 = vmatprep.subr.bf16.mxu0 %v1704_v23  ;;  %1513 = vmatprep.subr.bf16.mxu1 %v1705_v24 }
 0x1d5   :  { %v544_v23 = vrot.slane %v515_v60, %v543_v21 }
 0x1d7   :  { %1217 = vmatpush1.bf16.msra.mxu0 %v1702_v25  ;;  %1514 = vmatpush3.bf16.msra.mxu1 %v1706_v26 }
 0x1d8   :  { %1218 = vmatprep.subr.bf16.mxu0 %v1709_v27  ;;  %1515 = vmatprep.subr.bf16.mxu1 %v1710_v28 }
 0x1db   :  { %1219 = vmatpush1.bf16.msra.mxu0 %v1707_v29  ;;  %1516 = vmatpush3.bf16.msra.mxu1 %v1711_v30 }
 0x1dc   :  { %1220 = vmatprep.subr.bf16.mxu0 %v1714_v31  ;;  %1517 = vmatprep.subr.bf16.mxu1 %v1715_v32  ;;  %v535_v31 = vsub.s32 4, %v2041_v8  ;;  %v539_v32 = vsub.s32 5, %v2041_v8 }
 0x1df   :  { %1221 = vmatpush1.bf16.msra.mxu0 %v1712_v33  ;;  %1518 = vmatpush3.bf16.msra.mxu1 %v1716_v34  ;;  %v536_v33 = vrot.slane %v515_v60, %v535_v31  ;;  %v540_v34 = vrot.slane %v515_v60, %v539_v32 }
 0x1e0   :  { %1222 = vmatprep.subr.bf16.mxu0 %v1719_v35  ;;  %1519 = vmatprep.subr.bf16.mxu1 %v1720_v36 }
 0x1e3   :  { %1223 = vmatpush1.bf16.msra.mxu0 %v1717_v37  ;;  %1520 = vmatpush3.bf16.msra.mxu1 %v1721_v38 }
 0x1e4   :  { %1224 = vmatprep.subr.bf16.mxu0 %v1724_v39  ;;  %1521 = vmatprep.subr.bf16.mxu1 %v1725_v40 }
 0x1e7   :  { %1225 = vmatpush1.bf16.msra.mxu0 %v1722_v41  ;;  %1522 = vmatpush3.bf16.msra.mxu1 %v1726_v42 }
 0x1e8   :  { %1226 = vmatprep.subr.bf16.mxu0 %v1729_v43 }
 0x1ea   :  { %1284 = vmatmul.mubr.bf16.vlgmr.msra.gmra.mrb[8].mxu1 %v2176_v14 }
 0x1eb   :  { %1227 = vmatpush1.bf16.msra.mxu0 %v1727_v44 }
 0x1ec   :  { %1228 = vmatprep.subr.bf16.mxu0 %v1732_v45 }
 0x1ef   :  { %1229 = vmatpush1.bf16.msra.mxu0 %v1730_v46 }
 0x1f0   :  { %1230 = vmatprep.subr.bf16.mxu0 %v1735_v47 }
 0x1f3   :  { %1231 = vmatpush1.bf16.msra.mxu0 %v1733_v48 }
 0x1f4   :  { %1232 = vmatprep.subr.bf16.mxu0 %v1738_v49 }
 0x1f7   :  { %1233 = vmatpush1.bf16.msra.mxu0 %v1736_v50 }
 0x1f8   :  { %1234 = vmatprep.subr.bf16.mxu0 %v1741_v51 }
 0x1fb   :  { %1235 = vmatpush1.bf16.msra.mxu0 %v1739_v52 }
 0x1fc   :  { %1236 = vmatprep.subr.bf16.mxu0 %v1744_v53 }
 0x1ff   :  { %1237 = vmatpush1.bf16.msra.mxu0 %v1742_v54 }
 0x200   :  { %1238 = vmatprep.subr.bf16.mxu0 %v1747_v55 }
 0x203   :  { %1239 = vmatpush1.bf16.msra.mxu0 %v1745_v56 }
 0x204   :  { %1240 = vmatprep.subr.bf16.mxu0 %v1750_v57 }
 0x207   :  { %1241 = vmatpush1.bf16.msra.mxu0 %v1748_v58 }
 0x20a   :  { %1243 = vmatmul.mubr.bf16.vlgmr.msra.gmra.mrb[8].mxu0 %v2176_v14 }
 0x29d   :  { %v1162_v2 = vpop.f32.mrb[4].mxu0  ;;  %v1203_v3 = vpop.f32.mrb[4].mxu1 }
 0x29e   :  { %v1163_v4 = vadd.f32 %v1162_v2, %v520_v62  ;;  %v1204_v5 = vadd.f32 %v1203_v3, %v528_v63  ;;  %v1164_v6 = vpop.f32.mrb[5].mxu0  ;;  %v1205_v7 = vpop.f32.mrb[5].mxu1 }
 0x29f   :  { %v1165_v10 = vadd.f32 %v1164_v6, %v524_v0  ;;  %v1206_v12 = vadd.f32 %v1205_v7, %v532_v1  ;;  %v1166_v13 = vpop.f32.mrb[6].mxu0  ;;  %v1207_v14 = vpop.f32.mrb[6].mxu1 }
 0x2a0   :  { %1751 = vtanh.f32 %v1163_v4  ;;  %v1167_v15 = vpop.f32.mrb[7].mxu0  ;;  %v1208_v16 = vpop.f32.mrb[7].mxu1 }
 0x2a1   :  { %1753 = vtanh.f32 %v1204_v5 }
 0x2a2   :  { %1755 = vtanh.f32 %v1165_v10 }
 0x2a3   :  { %1757 = vtanh.f32 %v1206_v12 }
 0x2aa   :  { %v1752_v9 = vpop.eup %1751 }
 0x2ab   :  { %v1754_v17 = vpop.eup %1753 }
 0x2ac   :  { %v1756_v11 = vpop.eup %1755 }
 0x2ad   :  { %v1758_v18 = vpop.eup %1757  ;;  %v1503_v19 = vpack.c.bf16 %v1756_v11, %v1752_v9 }
 0x2ae   :  { %v1504_v20 = vpack.c.bf16 %v1758_v18, %v1754_v17 }
 0x2af   :  { %1327 = vst [vmem:[#allocation2] sm:$0xff] %v1503_v19 }
 0x2b0   :  { %1328 = vst [vmem:[#allocation2 + $0x8] sm:$0xff] %v1504_v20 }
 0x2bd   :  { %v1523_v22 = vpop.f32.mrb[8].mxu1 }
 0x2be   :  { %v1524_v24 = vpop.f32.mrb[9].mxu1 }
 0x2bf   :  { %v1525_v25 = vadd.f32 %v1524_v24, %v1523_v22  ;;  %v1526_v26 = vpop.f32.mrb[10].mxu1 }
 0x2c0   :  { %v1527_v27 = vpop.f32.mrb[11].mxu1 }
 0x2c1   :  { %v1286_v28 = vadd.f32 %v1525_v25, %v544_v23 }
 0x2c3   :  { %1759 = vtanh.f32 %v1286_v28 }
 0x2cd   :  { %v1760_v29 = vpop.eup %1759 }
 0x2ce   :  { %v1506_v30 = vpack.c.bf16 %v1760_v29, %v1760_v29 }
 0x2d0   :  { %1331 = vst.msk [vmem:[#allocation2 + $0x18] sm:$0xf] %vm1330_vm1, %v1506_v30 }
 0x2dd   :  { %v1244_v35 = vpop.f32.mrb[8].mxu0 }
 0x2de   :  { %v1245_v36 = vadd.f32 %v1244_v35, %v536_v33  ;;  %v1246_v37 = vpop.f32.mrb[9].mxu0 }
 0x2df   :  { %v1247_v38 = vadd.f32 %v1246_v37, %v540_v34  ;;  %v1248_v39 = vpop.f32.mrb[10].mxu0 }
 0x2e0   :  { %1761 = vtanh.f32 %v1245_v36  ;;  %v1249_v40 = vpop.f32.mrb[11].mxu0 }
 0x2e1   :  { %1763 = vtanh.f32 %v1247_v38 }
 0x2ea   :  { %v1762_v41 = vpop.eup %1761 }
 0x2eb   :  { %v1764_v42 = vpop.eup %1763 }
 0x2ec   :  { %v1505_v43 = vpack.c.bf16 %v1764_v42, %v1762_v41 }
 0x2ee   :  { %1329 = vst [vmem:[#allocation2 + $0x10] sm:$0xff] %v1505_v43 }
 0x2ef   :  { %1776 = shalt.err (!%p1773_p4)
}
 0x2f0   :  { %s1777_s21 = scalar_lea.hbm %s2343_s7, 448 }
 0x2f1   :  { %p1778_p5 = scmp.ne.s32.totalorder %s2343_s7, %s1777_s21  ;;  %p1781_p6 = scmp.lt.u32.totalorder %s1777_s21, %s2343_s7 }
 0x2f3   :  { %p1783_p7 = pnand %p1781_p6, %p1778_p5 }
 0x2f5   :  { %1786 = shalt.err (!%p1783_p7)
}
 0x2f6   :  { %1341 = dma.vmem_to_hbm [thread:$0]  %s1339_s6, 448, %s2343_s7, [#allocation3]  }
 0x2f7   :  { %1787 = dma.done.wait [#allocation3], 448  }
 0x2f8   :  { %1788 = vsyncadd [#allocation3], 4294966848 }
 0x2f9   :  { %1345 = vsyncpa [#allocation3], 1 }

</bundles_post_ra>
